<compile_context>
chip_gen: v7x
topology: tpu7x:2x2x1
jax: 0.10.0
libtpu: 0.0.40
codegen_flags: <defaults>
</compile_context>

<pallas_src>
import functools

import jax
import jax.numpy as jnp
from jax import lax
from jax.experimental import pallas as pl
from jax.experimental.pallas import tpu as pltpu

GAMMA = 3.0           # self.gamma in the reference
ALPHA = 0.25          # self.alpha — defined in __init__ but unused in forward
LANES = 128
MAX_BLOCK_ROWS = 1024  # 1024 x 128 f32 = 512 KiB per input per buffer
SUB_ROWS = 32          # inner sub-chunk: 4 vregs per f32 intermediate


def _cdiv(a, b):
    return -(-a // b)


def _round_up(a, m):
    return _cdiv(a, m) * m


def _num_tensorcores():
    """2 TensorCores per chip on v7x, 1 on v5e/v6e. Conservative default 1."""
    try:
        kind = jax.devices()[0].device_kind.lower()
    except Exception:
        return 1
    # TODO(synk): on v7x verify the leading grid axis truly shards across both
    # TensorCores; switch to pltpu.CORE_PARALLEL if an xprof trace shows not.
    return 2 if "v7" in kind else 1


def _focal_terms(x, t, gamma):
    """Elementwise base = (1-pt)**gamma * ce and posf = float(t > 0)."""
    e = jnp.exp(-jnp.abs(x))                       # EUP
    denom = 1.0 + e
    inv0 = pl.reciprocal(denom, approx=True)       # EUP slot (free-ish)
    inv = inv0 * (2.0 - denom * inv0)              # 1 Newton step -> ~1e-7 rel
    # 1 - pt directly: sigmoid = inv (x>=0) / e*inv (x<0); 1-sigmoid swaps.
    u = jnp.where(jnp.logical_xor(t == 1.0, x < 0.0), e * inv, inv)
    # Numerically stable BCE-with-logits (same as torch's implementation).
    ce = jnp.maximum(x, 0.0) - x * t + jnp.log1p(e)
    g = float(gamma)
    if g == 3.0:
        focal = u * u * u                          # two VPU muls, no pow
    elif g == int(g) and g >= 0.0:
        focal = u ** int(g)
    else:
        focal = u ** jnp.float32(g)
    base = focal * ce
    posf = (t > 0.0).astype(jnp.float32)
    return base, posf


def _block_partials(x_ref, t_ref, row0, *, sub_rows, n_sub, rows_valid, gamma,
                    masked, unroll):
    """Sum one (block_rows,128) tile into three (8,128) partials."""
    zero = jnp.zeros((8, LANES), jnp.float32)
    if masked:
        row_iota = lax.broadcasted_iota(jnp.int32, (sub_rows, LANES), 0)

    def body(j, carry):
        s_tot, s_pos, s_cnt = carry
        r0 = pl.multiple_of(j * sub_rows, 8)
        x = x_ref[pl.ds(r0, sub_rows), :].astype(jnp.float32)
        t = t_ref[pl.ds(r0, sub_rows), :].astype(jnp.float32)
        base, posf = _focal_terms(x, t, gamma)
        if masked:
            # Edge block: rows >= rows_valid are uninitialized padding.
            valid = (row_iota + (row0 + j * sub_rows)) < rows_valid
            base = jnp.where(valid, base, 0.0)
            posf = jnp.where(valid, posf, 0.0)
        k = sub_rows // 8
        s_tot = s_tot + jnp.sum(base.reshape(k, 8, LANES), axis=0)
        s_pos = s_pos + jnp.sum((base * posf).reshape(k, 8, LANES), axis=0)
        s_cnt = s_cnt + jnp.sum(posf.reshape(k, 8, LANES), axis=0)
        return s_tot, s_pos, s_cnt

    return lax.fori_loop(0, n_sub, body, (zero, zero, zero), unroll=unroll)


def _focal_loss_kernel(x_ref, t_ref, acc_ref, *, steps, block_rows, sub_rows,
                       n_sub, rows_valid, gamma, needs_mask):
    c = pl.program_id(0)
    s = pl.program_id(1)

    @pl.when(s == 0)
    def _init():
        acc_ref[...] = jnp.zeros_like(acc_ref)

    row0 = (c * steps + s) * block_rows

    def accumulate(masked, unroll):
        s_tot, s_pos, s_cnt = _block_partials(
            x_ref, t_ref, row0, sub_rows=sub_rows, n_sub=n_sub,
            rows_valid=rows_valid, gamma=gamma, masked=masked, unroll=unroll)
        acc_ref[0, 0] += s_tot
        acc_ref[0, 1] += s_pos
        acc_ref[0, 2] += s_cnt

    if needs_mask:
        @pl.when(row0 + block_rows <= rows_valid)
        def _full_block():
            accumulate(masked=False, unroll=True)

        @pl.when(row0 + block_rows > rows_valid)
        def _edge_block():                    # cold path: at most one block
            accumulate(masked=True, unroll=False)
    else:
        accumulate(masked=False, unroll=True)


def focal_loss(pred_logits, target, gamma=GAMMA):
    """pred_logits, target: any (identical) shape; returns scalar f32 loss."""
    x = pred_logits.reshape(-1)           # native dtype; cast to f32 in-kernel
    t = target.reshape(-1)
    n_total = x.shape[0]
    n = jnp.float32(n_total)

    itemsize = min(x.dtype.itemsize, t.dtype.itemsize)
    row_mult = {4: 8, 2: 16, 1: 32}.get(itemsize, 8)   # packed-sublane multiple

    rows_all = n_total // LANES
    if rows_all > SUB_ROWS:
        rows_k = (rows_all // SUB_ROWS) * SUB_ROWS     # blocks stay 32-aligned
    else:
        rows_k = (rows_all // row_mult) * row_mult
    n_kernel = rows_k * LANES

    s_total = jnp.float32(0.0)
    s_pos = jnp.float32(0.0)
    cnt = jnp.float32(0.0)

    if rows_k > 0:
        # Zero-copy reshape when N is row-aligned; otherwise only a slice of
        # the main part is materialized — never a full padded concatenate.
        xk = x if n_kernel == n_total else x[:n_kernel]
        tk = t if n_kernel == n_total else t[:n_kernel]
        x2 = xk.reshape(rows_k, LANES)
        t2 = tk.reshape(rows_k, LANES)

        num_chunks = _num_tensorcores() if rows_k >= 8 * SUB_ROWS else 1
        chunk_rows = _cdiv(rows_k, num_chunks)
        steps = max(1, _cdiv(chunk_rows, MAX_BLOCK_ROWS))
        block_rows = _cdiv(chunk_rows, steps)
        if rows_k > SUB_ROWS:
            block_rows = _round_up(block_rows, SUB_ROWS)
            sub_rows = SUB_ROWS
        else:
            block_rows = rows_k
            sub_rows = rows_k
        n_sub = block_rows // sub_rows
        covered = num_chunks * steps * block_rows
        needs_mask = covered > rows_k
        last_block = _cdiv(rows_k, block_rows) - 1

        kernel = functools.partial(
            _focal_loss_kernel, steps=steps, block_rows=block_rows,
            sub_rows=sub_rows, n_sub=n_sub, rows_valid=rows_k, gamma=gamma,
            needs_mask=needs_mask)

        def in_map(c, s):
            # Clamp so over-covering grid points never index past the array;
            # their contribution is zeroed by the edge-block mask anyway.
            return (jnp.minimum(c * steps + s, last_block), 0)

        partials = pl.pallas_call(
            kernel,
            out_shape=jax.ShapeDtypeStruct((num_chunks, 3, 8, LANES),
                                           jnp.float32),
            grid_spec=pltpu.PrefetchScalarGridSpec(
                num_scalar_prefetch=0,
                grid=(num_chunks, steps),
                in_specs=[
                    pl.BlockSpec((block_rows, LANES), in_map),
                    pl.BlockSpec((block_rows, LANES), in_map),
                ],
                # Output block constant along the reduction axis -> resident
                # per-chunk accumulator.
                out_specs=pl.BlockSpec((1, 3, 8, LANES),
                                       lambda c, s: (c, 0, 0, 0)),
            ),
            compiler_params=pltpu.CompilerParams(
                dimension_semantics=("parallel", "arbitrary"),
            ),
        )(x2, t2)

        sums = jnp.sum(partials, axis=(0, 2, 3))   # [S_total, S_pos, count]
        s_total, s_pos, cnt = sums[0], sums[1], sums[2]

    if n_kernel < n_total:
        # Tiny leftover (< SUB_ROWS rows + one partial row): plain jnp.
        xt = x[n_kernel:].astype(jnp.float32)
        tt = t[n_kernel:].astype(jnp.float32)
        sig = jax.nn.sigmoid(xt)
        ce = jnp.maximum(xt, 0.0) - xt * tt + jnp.log1p(jnp.exp(-jnp.abs(xt)))
        pt = jnp.where(tt == 1.0, sig, 1.0 - sig)
        base = (1.0 - pt) ** gamma * ce
        posf = (tt > 0.0).astype(jnp.float32)
        s_total = s_total + jnp.sum(base)
        s_pos = s_pos + jnp.sum(base * posf)
        cnt = cnt + jnp.sum(posf)

    neg_w = cnt / n
    pos_w = 1.0 - neg_w
    return (pos_w * s_pos + neg_w * (s_total - s_pos)) / n


def focal_loss_ref(pred_logits, target, gamma=GAMMA):
    """Pure-JAX reference mirroring the PyTorch forward."""
    x = pred_logits.reshape(-1).astype(jnp.float32)
    t = target.reshape(-1).astype(jnp.float32)
    tw = jnp.where(t > 0.0, 1.0, 0.0)
    neg_w = tw.sum() / tw.shape[0]
    pos_w = 1.0 - neg_w
    alpha = jnp.where(tw > 0.0, pos_w, neg_w)
    pred = jax.nn.sigmoid(x)
    ce = jnp.maximum(x, 0.0) - x * t + jnp.log1p(jnp.exp(-jnp.abs(x)))
    pt = jnp.where(t == 1.0, pred, 1.0 - pred)
    return jnp.mean(alpha * (1.0 - pt) ** gamma * ce)


if __name__ == "__main__":
    key = jax.random.PRNGKey(0)
    ks = jax.random.split(key, 6)

    # NCHW-shaped logits/targets, as a detector head would produce (128-aligned).
    B, C, H, W = 2, 4, 16, 16
    x1 = jax.random.normal(ks[0], (B, C, H, W), dtype=jnp.float32)
    t1 = jax.random.bernoulli(ks[1], p=0.25, shape=(B, C, H, W)).astype(jnp.float32)
    out1 = jax.block_until_ready(focal_loss(x1, t1))
    ref1 = jax.block_until_ready(focal_loss_ref(x1, t1))
    assert jnp.allclose(out1, ref1, rtol=5e-5, atol=1e-6), (out1, ref1)

    # Ragged size: exercises the jnp tail path (n % 128 != 0).
    x2 = jax.random.normal(ks[2], (3, 5, 7, 11), dtype=jnp.float32)
    t2 = jax.random.bernoulli(ks[3], p=0.1, shape=(3, 5, 7, 11)).astype(jnp.float32)
    out2 = jax.block_until_ready(focal_loss(x2, t2))
    ref2 = jax.block_until_ready(focal_loss_ref(x2, t2))
    assert jnp.allclose(out2, ref2, rtol=5e-5, atol=1e-6), (out2, ref2)

    # Medium size: exercises the multi-step grid, the unrolled sub-chunk loop
    # and the masked edge-block branch (1056 rows -> 544-row blocks, last partial).
    x3 = jax.random.normal(ks[4], (2, 4, 132, 128), dtype=jnp.float32)
    t3 = jax.random.bernoulli(ks[5], p=0.3, shape=(2, 4, 132, 128)).astype(jnp.float32)
    out3 = jax.block_until_ready(focal_loss(x3, t3))
    ref3 = jax.block_until_ready(focal_loss_ref(x3, t3))
    assert jnp.allclose(out3, ref3, rtol=5e-5, atol=1e-6), (out3, ref3)

    print("KERNEL_OK")
</pallas_src>

<mosaic_0001>
module attributes {stable_mosaic.version = 11 : i64} {
  func.func @_focal_loss_kernel(%arg0: i32, %arg1: i32, %arg2: memref<16x128xf32, #tpu.memory_space<vmem>>, %arg3: memref<16x128xf32, #tpu.memory_space<vmem>>, %arg4: memref<1x3x8x128xf32, #tpu.memory_space<vmem>>) attributes {dimension_semantics = [#tpu.dimension_semantics<parallel>, #tpu.dimension_semantics<arbitrary>], iteration_bounds = array<i64: 1, 1>, scalar_prefetch = 0 : i64, scratch_operands = 0 : i64, tpu.core_type = #tpu.core_type<tc>, window_params = [{transform_indices = @transform_0, window_bounds = array<i64: 16, 128>}, {transform_indices = @transform_1, window_bounds = array<i64: 16, 128>}, {transform_indices = @transform_2, window_bounds = array<i64: 1, 3, 8, 128>}]} {
    %c0_i32 = arith.constant 0 : i32
    %0 = arith.cmpi eq, %arg1, %c0_i32 : i32
    %1 = arith.extui %0 : i1 to i32
    %c0_i32_0 = arith.constant 0 : i32
    %2 = arith.cmpi ne, %1, %c0_i32_0 : i32
    scf.if %2 {
      %cst_35 = arith.constant 0.000000e+00 : f32
      %69 = vector.broadcast %cst_35 : f32 to vector<1x3x8x128xf32>
      %c0_36 = arith.constant 0 : index
      %c0_37 = arith.constant 0 : index
      %c0_38 = arith.constant 0 : index
      %c0_39 = arith.constant 0 : index
      %70 = vector.load %arg4[%c0_36, %c0_37, %c0_38, %c0_39] : memref<1x3x8x128xf32, #tpu.memory_space<vmem>>, vector<1x3x8x128xf32>
      tpu.vector_store %arg4[%c0_36, %c0_37, %c0_38, %c0_39], %69 {strides = array<i32>} : memref<1x3x8x128xf32, #tpu.memory_space<vmem>>, vector<1x3x8x128xf32>,
    } else {
    }
    %cst = arith.constant 0.000000e+00 : f32
    %3 = vector.broadcast %cst : f32 to vector<8x128xf32>
    %c0_i32_1 = arith.constant 0 : i32
    %c16_i32 = arith.constant 16 : i32
    %4 = arith.muli %c0_i32_1, %c16_i32 : i32
    %5 = tpu.assume_multiple %4, 8 : i32
    %6 = arith.index_cast %5 : i32 to index
    %c0 = arith.constant 0 : index
    %7 = vector.load %arg2[%6, %c0] : memref<16x128xf32, #tpu.memory_space<vmem>>, vector<16x128xf32>
    %8 = arith.index_cast %5 : i32 to index
    %c0_2 = arith.constant 0 : index
    %9 = vector.load %arg3[%8, %c0_2] : memref<16x128xf32, #tpu.memory_space<vmem>>, vector<16x128xf32>
    %10 = math.absf %7 : vector<16x128xf32>
    %cst_3 = arith.constant 0.000000e+00 : f32
    %11 = vector.broadcast %cst_3 : f32 to vector<16x128xf32>
    %12 = arith.subf %11, %10 : vector<16x128xf32>
    %13 = math.exp %12 : vector<16x128xf32>
    %cst_4 = arith.constant 1.000000e+00 : f32
    %14 = vector.broadcast %cst_4 : f32 to vector<16x128xf32>
    %15 = arith.addf %14, %13 : vector<16x128xf32>
    %16 = tpu.reciprocal %15 {approx = true} : vector<16x128xf32> -> vector<16x128xf32>
    %17 = arith.mulf %15, %16 : vector<16x128xf32>
    %cst_5 = arith.constant 2.000000e+00 : f32
    %18 = vector.broadcast %cst_5 : f32 to vector<16x128xf32>
    %19 = arith.subf %18, %17 : vector<16x128xf32>
    %20 = arith.mulf %16, %19 : vector<16x128xf32>
    %cst_6 = arith.constant 1.000000e+00 : f32
    %21 = vector.broadcast %cst_6 : f32 to vector<16x128xf32>
    %22 = arith.cmpf oeq, %9, %21 : vector<16x128xf32>
    %cst_7 = arith.constant 0.000000e+00 : f32
    %23 = vector.broadcast %cst_7 : f32 to vector<16x128xf32>
    %24 = arith.cmpf olt, %7, %23 : vector<16x128xf32>
    %25 = arith.xori %22, %24 : vector<16x128xi1>
    %26 = arith.mulf %13, %20 : vector<16x128xf32>
    %27 = arith.select %25, %26, %20 : vector<16x128xi1>, vector<16x128xf32>
    %cst_8 = arith.constant 0.000000e+00 : f32
    %28 = vector.broadcast %cst_8 : f32 to vector<16x128xf32>
    %29 = arith.maximumf %7, %28 : vector<16x128xf32>
    %30 = arith.mulf %7, %9 : vector<16x128xf32>
    %31 = arith.subf %29, %30 : vector<16x128xf32>
    %32 = math.log1p %13 : vector<16x128xf32>
    %33 = arith.addf %31, %32 : vector<16x128xf32>
    %34 = arith.mulf %27, %27 : vector<16x128xf32>
    %35 = arith.mulf %34, %27 : vector<16x128xf32>
    %36 = arith.mulf %35, %33 : vector<16x128xf32>
    %cst_9 = arith.constant 0.000000e+00 : f32
    %37 = vector.broadcast %cst_9 : f32 to vector<16x128xf32>
    %38 = arith.cmpf ogt, %9, %37 : vector<16x128xf32>
    %39 = arith.extui %38 : vector<16x128xi1> to vector<16x128xi32>
    %40 = arith.sitofp %39 : vector<16x128xi32> to vector<16x128xf32>
    %41 = vector.shape_cast %36 : vector<16x128xf32> to vector<2x8x128xf32>
    %cst_10 = arith.constant dense<0.000000e+00> : vector<8x128xf32>
    %42 = vector.multi_reduction <add>, %41, %cst_10 [0] : vector<2x8x128xf32> to vector<8x128xf32>
    %43 = arith.addf %3, %42 : vector<8x128xf32>
    %44 = arith.mulf %36, %40 : vector<16x128xf32>
    %45 = vector.shape_cast %44 : vector<16x128xf32> to vector<2x8x128xf32>
    %cst_11 = arith.constant dense<0.000000e+00> : vector<8x128xf32>
    %46 = vector.multi_reduction <add>, %45, %cst_11 [0] : vector<2x8x128xf32> to vector<8x128xf32>
    %47 = arith.addf %3, %46 : vector<8x128xf32>
    %48 = vector.shape_cast %40 : vector<16x128xf32> to vector<2x8x128xf32>
    %cst_12 = arith.constant dense<0.000000e+00> : vector<8x128xf32>
    %49 = vector.multi_reduction <add>, %48, %cst_12 [0] : vector<2x8x128xf32> to vector<8x128xf32>
    %50 = arith.addf %3, %49 : vector<8x128xf32>
    %c1_i32 = arith.constant 1 : i32
    %c0_13 = arith.constant 0 : index
    %c0_14 = arith.constant 0 : index
    %c0_15 = arith.constant 0 : index
    %c0_16 = arith.constant 0 : index
    %51 = vector.load %arg4[%c0_13, %c0_14, %c0_15, %c0_16] : memref<1x3x8x128xf32, #tpu.memory_space<vmem>>, vector<1x1x8x128xf32>
    %52 = vector.shape_cast %51 : vector<1x1x8x128xf32> to vector<8x128xf32>
    %53 = arith.addf %52, %43 : vector<8x128xf32>
    %c0_17 = arith.constant 0 : index
    %c0_18 = arith.constant 0 : index
    %c0_19 = arith.constant 0 : index
    %c0_20 = arith.constant 0 : index
    %54 = vector.load %arg4[%c0_17, %c0_18, %c0_19, %c0_20] : memref<1x3x8x128xf32, #tpu.memory_space<vmem>>, vector<1x1x8x128xf32>
    %55 = vector.shape_cast %54 : vector<1x1x8x128xf32> to vector<8x128xf32>
    %56 = vector.shape_cast %53 : vector<8x128xf32> to vector<1x1x8x128xf32>
    tpu.vector_store %arg4[%c0_17, %c0_18, %c0_19, %c0_20], %56 {strides = array<i32>} : memref<1x3x8x128xf32, #tpu.memory_space<vmem>>, vector<1x1x8x128xf32>,
    %c0_21 = arith.constant 0 : index
    %c1 = arith.constant 1 : index
    %c0_22 = arith.constant 0 : index
    %c0_23 = arith.constant 0 : index
    %57 = vector.load %arg4[%c0_21, %c1, %c0_22, %c0_23] : memref<1x3x8x128xf32, #tpu.memory_space<vmem>>, vector<1x1x8x128xf32>
    %58 = vector.shape_cast %57 : vector<1x1x8x128xf32> to vector<8x128xf32>
    %59 = arith.addf %58, %47 : vector<8x128xf32>
    %c0_24 = arith.constant 0 : index
    %c1_25 = arith.constant 1 : index
    %c0_26 = arith.constant 0 : index
    %c0_27 = arith.constant 0 : index
    %60 = vector.load %arg4[%c0_24, %c1_25, %c0_26, %c0_27] : memref<1x3x8x128xf32, #tpu.memory_space<vmem>>, vector<1x1x8x128xf32>
    %61 = vector.shape_cast %60 : vector<1x1x8x128xf32> to vector<8x128xf32>
    %62 = vector.shape_cast %59 : vector<8x128xf32> to vector<1x1x8x128xf32>
    tpu.vector_store %arg4[%c0_24, %c1_25, %c0_26, %c0_27], %62 {strides = array<i32>} : memref<1x3x8x128xf32, #tpu.memory_space<vmem>>, vector<1x1x8x128xf32>,
    %c0_28 = arith.constant 0 : index
    %c2 = arith.constant 2 : index
    %c0_29 = arith.constant 0 : index
    %c0_30 = arith.constant 0 : index
    %63 = vector.load %arg4[%c0_28, %c2, %c0_29, %c0_30] : memref<1x3x8x128xf32, #tpu.memory_space<vmem>>, vector<1x1x8x128xf32>
    %64 = vector.shape_cast %63 : vector<1x1x8x128xf32> to vector<8x128xf32>
    %65 = arith.addf %64, %50 : vector<8x128xf32>
    %c0_31 = arith.constant 0 : index
    %c2_32 = arith.constant 2 : index
    %c0_33 = arith.constant 0 : index
    %c0_34 = arith.constant 0 : index
    %66 = vector.load %arg4[%c0_31, %c2_32, %c0_33, %c0_34] : memref<1x3x8x128xf32, #tpu.memory_space<vmem>>, vector<1x1x8x128xf32>
    %67 = vector.shape_cast %66 : vector<1x1x8x128xf32> to vector<8x128xf32>
    %68 = vector.shape_cast %65 : vector<8x128xf32> to vector<1x1x8x128xf32>
    tpu.vector_store %arg4[%c0_31, %c2_32, %c0_33, %c0_34], %68 {strides = array<i32>} : memref<1x3x8x128xf32, #tpu.memory_space<vmem>>, vector<1x1x8x128xf32>,
    return
  }
  func.func @transform_0(%arg0: i32, %arg1: i32) -> (i32, i32) {
    %c1_i32 = arith.constant 1 : i32
    %0 = arith.muli %arg0, %c1_i32 : i32
    %1 = arith.addi %0, %arg1 : i32
    %c0_i32 = arith.constant 0 : i32
    %2 = arith.minsi %1, %c0_i32 : i32
    %c0_i32_0 = arith.constant 0 : i32
    %c0_i32_1 = arith.constant 0 : i32
    return %2, %c0_i32_0 : i32, i32
  }
  func.func @transform_1(%arg0: i32, %arg1: i32) -> (i32, i32) {
    %c1_i32 = arith.constant 1 : i32
    %0 = arith.muli %arg0, %c1_i32 : i32
    %1 = arith.addi %0, %arg1 : i32
    %c0_i32 = arith.constant 0 : i32
    %2 = arith.minsi %1, %c0_i32 : i32
    %c0_i32_0 = arith.constant 0 : i32
    %c0_i32_1 = arith.constant 0 : i32
    return %2, %c0_i32_0 : i32, i32
  }
  func.func @transform_2(%arg0: i32, %arg1: i32) -> (i32, i32, i32, i32) {
    %c0_i32 = arith.constant 0 : i32
    %c0_i32_0 = arith.constant 0 : i32
    %c0_i32_1 = arith.constant 0 : i32
    %c0_i32_2 = arith.constant 0 : i32
    return %arg0, %c0_i32, %c0_i32_0, %c0_i32_1 : i32, i32, i32, i32
  }
}

</mosaic_0001>

<bundles_post_ra>
// kernel: tpu_custom_call.1
= control target key start
LH: loop header
LB: loop body
LE: loop exit
PB: predicated region body
PF: predicated region fallthrough
CT: control target
= control target key end

     0   :  { %7 = vsyncpa [#allocation3], 0  ;;  %s350_s0 = inlined_call_operand.hbm [shape: f32[16,128], index: 0, kind: input, shape index: {}]   ;;  %s351_s1 = inlined_call_operand.hbm [shape: f32[16,128], index: 1, kind: input, shape index: {}]   ;;  %s352_s2 = inlined_call_operand.hbm [shape: f32[1,3,8,128], index: 2, kind: output, shape index: {}]  }
   0x1   :  { %8 = vsyncpa [#allocation6], 0 }
   0x2   :  { %9 = vsyncpa [#allocation4], 0  ;;  %s270_s9 = smov [#allocation2]   ;;  %s198_s13 = scalar_lea.hbm %s350_s0, 256 }
   0x3   :  { %s21_s10 = sshll.u32 %s270_s9, 4  ;;  %p199_p0 = scmp.ne.s32.totalorder %s350_s0, %s198_s13  ;;  %s22_s10 = int_to_ptr.vmem [resolvable:$true] %s21_s10 }
   0x4   :  { %p202_p1 = scmp.lt.u32.totalorder %s198_s13, %s350_s0 }
   0x6   :  { %p204_p2 = pnand %p202_p1, %p199_p0 }
   0x8   :  { %207 = shalt.err (!%p204_p2)
}
   0x9   :  { %s208_s18 = scalar_lea.vmem %s22_s10, 256  ;;  %p213_p4 = scmp.lt.s32.totalorder %s22_s10, %s22_s10 }
   0xa   :  { %p209_p3 = scmp.ne.s32.totalorder %s22_s10, %s208_s18  ;;  %p214_p5 = scmp.lt.s32.totalorder %s208_s18, %s208_s18 }
   0xc   :  { %p215_p6 = por %p214_p5, %p213_p4 }
   0xe   :  { %p216_p7 = pnand %p215_p6, %p209_p3 }
  0x10   :  { %219 = shalt.err (!%p216_p7)
}
  0x11   :  { %s271_s19 = smov 128   ;;  %s272_s20 = smov 8  }
  0x12   :  { %27 = dma.hbm_to_vmem [thread:$0]  %s350_s0, 256, %s22_s10, [#allocation3], %s271_s19, %s271_s19, %s272_s20  }
  0x13   :  { %s273_s23 = smov [#allocation5]   ;;  %s220_s27 = scalar_lea.hbm %s351_s1, 256 }
  0x14   :  { %s39_s24 = sshll.u32 %s273_s23, 4  ;;  %p221_p8 = scmp.ne.s32.totalorder %s351_s1, %s220_s27  ;;  %s40_s24 = int_to_ptr.vmem [resolvable:$true] %s39_s24 }
  0x15   :  { %p224_p9 = scmp.lt.u32.totalorder %s220_s27, %s351_s1 }
  0x17   :  { %p226_p10 = pnand %p224_p9, %p221_p8 }
  0x19   :  { %229 = shalt.err (!%p226_p10)
}
  0x1a   :  { %s230_s4 = scalar_lea.vmem %s40_s24, 256  ;;  %p235_p12 = scmp.lt.s32.totalorder %s40_s24, %s40_s24 }
  0x1b   :  { %p231_p11 = scmp.ne.s32.totalorder %s40_s24, %s230_s4  ;;  %p236_p13 = scmp.lt.s32.totalorder %s230_s4, %s230_s4 }
  0x1d   :  { %p237_p0 = por %p236_p13, %p235_p12 }
  0x1f   :  { %p238_p1 = pnand %p237_p0, %p231_p11 }
  0x21   :  { %241 = shalt.err (!%p238_p1)
}
  0x22   :  { %45 = dma.hbm_to_vmem [thread:$0]  %s351_s1, 256, %s40_s24, [#allocation6], %s271_s19, %s271_s19, %s272_s20  }
  0x23   :  { %264 = dma.done.wait [#allocation3], 256  }
  0x24   :  { %265 = vsyncadd [#allocation3], 4294967040 }
  0x25   :  { %266 = dma.done.wait [#allocation6], 256  }
  0x26   :  { %267 = vsyncadd [#allocation6], 4294967040  ;;  %v67_v0 = vld [vmem:[#allocation2] sm:$0xff]  ;;  %v68_v1 = vld [vmem:[#allocation2 + $0x8] sm:$0xff]  ;;  %v274_v10 = vmov 0.0   ;;  %s275_s1 = smov [#allocation7]  }
  0x27   :  { %v71_v2 = vand.u32 2147483647, %v67_v0  ;;  %v72_v3 = vand.u32 2147483647, %v68_v1  ;;  %v69_v4 = vld [vmem:[#allocation5] sm:$0xff]  ;;  %v70_v5 = vld [vmem:[#allocation5 + $0x8] sm:$0xff] }
  0x28   :  { %vm131_vm0 = vcmp.gt.f32.partialorder %v69_v4, 0.0  ;;  %vm132_vm1 = vcmp.gt.f32.partialorder %v70_v5, 0.0  ;;  %vm89_vm2 = vcmp.eq.f32.partialorder %v69_v4, 1.0  ;;  %v101_v22 = vmul.f32 %v69_v4, %v67_v0  ;;  %s161_s6 = sshll.u32 %s275_s1, 4  ;;  %s162_s6 = int_to_ptr.vmem [resolvable:$true] %s161_s6 }
  0x29   :  { %v73_v6 = vsub.f32 0.0, %v71_v2  ;;  %v74_v7 = vsub.f32 0.0, %v72_v3  ;;  %v178_v11 = vsel %vm131_vm0, 1.0, %v274_v10  ;;  %v321_v12 = vsel %vm132_vm1, 1.0, %v274_v10  ;;  %s242_s7 = scalar_lea.vmem %s162_s6, 384  ;;  %p247_p3 = scmp.lt.s32.totalorder %s162_s6, %s162_s6 }
  0x2a   :  { %v143_v13 = vadd.f32 %v321_v12, %v178_v11  ;;  %vm90_vm3 = vcmp.eq.f32.partialorder %v70_v5, 1.0  ;;  %vm91_vm4 = vcmp.lt.f32.partialorder %v67_v0, 0.0  ;;  %vm92_vm5 = vcmp.lt.f32.partialorder %v68_v1, 0.0  ;;  %p243_p2 = scmp.ne.s32.totalorder %s162_s6, %s242_s7  ;;  %p248_p4 = scmp.lt.s32.totalorder %s242_s7, %s242_s7 }
  0x2b   :  { %v75_v8 = vmul.f32 1.442695, %v73_v6  ;;  %v77_v9 = vmul.f32 1.442695, %v74_v7  ;;  %v99_v30 = vmax.f32 %v67_v0, 0.0  ;;  %v100_v31 = vmax.f32 %v68_v1, 0.0  ;;  %vm93_vm8 = vmxor %vm89_vm2, %vm91_vm4 }
  0x2c   :  { %155 = vst [vmem:[#allocation7 + $0x10] sm:$0xff] %v143_v13  ;;  %v102_v34 = vmul.f32 %v70_v5, %v68_v1  ;;  %vm94_vm9 = vmxor %vm90_vm3, %vm92_vm5  ;;  %p249_p5 = por %p248_p4, %p247_p3 }
  0x2d   :  { %186 = vpow2.f32 %v75_v8  ;;  %v103_v43 = vsub.f32 %v99_v30, %v101_v22 }
  0x2e   :  { %188 = vpow2.f32 %v77_v9  ;;  %v104_v45 = vsub.f32 %v100_v31, %v102_v34  ;;  %p250_p6 = pnand %p249_p5, %p243_p2 }
  0x37   :  { %v187_v14 = vpop.eup %186 }
  0x38   :  { %v189_v15 = vpop.eup %188  ;;  %v79_v16 = vadd.f32 1.0, %v187_v14  ;;  %v108_v18 = vmul.f32 -0.5, %v187_v14  ;;  %v111_v23 = vand.u32 2147483647, %v187_v14 }
  0x39   :  { %v80_v17 = vadd.f32 1.0, %v189_v15  ;;  %v117_v19 = vmul.f32 -0.5, %v189_v15  ;;  %v120_v27 = vand.u32 2147483647, %v189_v15 }
  0x3a   :  { %190 = vrcp.f32 %v79_v16  ;;  %v109_v20 = vadd.f32 1.0, %v108_v18  ;;  %vm324_vm6 = vcmp.lt.f32.partialorder %v111_v23, 0.0004427343 }
  0x3b   :  { %192 = vrcp.f32 %v80_v17  ;;  %v118_v24 = vadd.f32 1.0, %v117_v19  ;;  %vm121_vm7 = vcmp.lt.f32.partialorder %v120_v27, 0.0004427343 }
  0x3c   :  { %194 = vlog2.f32 %v79_v16  ;;  %v110_v36 = vmul.f32 %v187_v14, %v109_v20 }
  0x3d   :  { %196 = vlog2.f32 %v80_v17  ;;  %v119_v40 = vmul.f32 %v189_v15, %v118_v24 }
  0x44   :  { %v191_v21 = vpop.eup %190 }
  0x45   :  { %v193_v25 = vpop.eup %192  ;;  %v83_v26 = vmul.f32 %v191_v21, %v79_v16 }
  0x46   :  { %v195_v28 = vpop.eup %194  ;;  %v84_v29 = vmul.f32 %v193_v25, %v80_v17 }
  0x47   :  { %v197_v32 = vpop.eup %196  ;;  %v85_v33 = vsub.f32 2.0, %v83_v26  ;;  %v107_v35 = vmul.f32 0.6931472, %v195_v28 }
  0x48   :  { %v86_v37 = vsub.f32 2.0, %v84_v29  ;;  %v116_v39 = vmul.f32 0.6931472, %v197_v32 }
  0x49   :  { %v87_v41 = vmul.f32 %v191_v21, %v85_v33  ;;  %v113_v46 = vsel %vm324_vm6, %v110_v36, %v107_v35 }
  0x4a   :  { %v88_v42 = vmul.f32 %v193_v25, %v86_v37  ;;  %v122_v48 = vsel %vm121_vm7, %v119_v40, %v116_v39  ;;  %v123_v51 = vadd.f32 %v113_v46, %v103_v43 }
  0x4b   :  { %v95_v44 = vmul.f32 %v187_v14, %v87_v41  ;;  %v124_v53 = vadd.f32 %v122_v48, %v104_v45 }
  0x4c   :  { %v96_v47 = vmul.f32 %v189_v15, %v88_v42 }
  0x4d   :  { %v97_v49 = vsel %vm93_vm8, %v95_v44, %v87_v41 }
  0x4e   :  { %v98_v50 = vsel %vm94_vm9, %v96_v47, %v88_v42  ;;  %v125_v52 = vmul.f32 %v97_v49, %v97_v49 }
  0x4f   :  { %v126_v54 = vmul.f32 %v98_v50, %v98_v50 }
  0x50   :  { %v127_v55 = vmul.f32 %v125_v52, %v97_v49 }
  0x51   :  { %v128_v56 = vmul.f32 %v126_v54, %v98_v50 }
  0x52   :  { %v129_v57 = vmul.f32 %v127_v55, %v123_v51 }
  0x53   :  { %v130_v58 = vmul.f32 %v128_v56, %v124_v53 }
  0x54   :  { %v139_v59 = vmul.f32 %v178_v11, %v129_v57 }
  0x55   :  { %v137_v60 = vadd.f32 %v130_v58, %v129_v57  ;;  %v140_v61 = vmul.f32 %v321_v12, %v130_v58 }
  0x57   :  { %v141_v62 = vadd.f32 %v140_v61, %v139_v59  ;;  %147 = vst [vmem:[#allocation7] sm:$0xff] %v137_v60 }
  0x59   :  { %151 = vst [vmem:[#allocation7 + $0x8] sm:$0xff] %v141_v62 }
  0x5a   :  { %253 = shalt.err (!%p250_p6)
}
  0x5b   :  { %s254_s10 = scalar_lea.hbm %s352_s2, 384 }
  0x5c   :  { %p255_p7 = scmp.ne.s32.totalorder %s352_s2, %s254_s10  ;;  %p258_p8 = scmp.lt.u32.totalorder %s254_s10, %s352_s2 }
  0x5e   :  { %p260_p9 = pnand %p258_p8, %p255_p7 }
  0x60   :  { %263 = shalt.err (!%p260_p9)
}
  0x61   :  { %167 = dma.vmem_to_hbm [thread:$0]  %s162_s6, 384, %s352_s2, [#allocation4], %s271_s19, %s271_s19, %s272_s20  }
  0x62   :  { %268 = dma.done.wait [#allocation4], 384  }
  0x63   :  { %269 = vsyncadd [#allocation4], 4294966912 }
  0x64   :  { %171 = vsyncpa [#allocation3], 1 }
  0x65   :  { %172 = vsyncpa [#allocation6], 1 }
  0x66   :  { %173 = vsyncpa [#allocation4], 1 }

</bundles_post_ra>
